<compile_context>
chip_gen: v5e
topology: v5e:2x2
jax: 0.10.0
libtpu: 0.0.40
codegen_flags: <defaults>
</compile_context>

<pallas_src>
import functools

import jax
import jax.numpy as jnp
from jax.experimental import pallas as pl
from jax.experimental.pallas import tpu as pltpu


def _t_dark_kernel(o_ref, e_ref, out_ref, *, c_o, inv_m, tm, m_total, mask_m_tail):
    """Accumulate per-image sums of (e + c_o * o) along the M grid axis.

    out_ref (TB, 1) doubles as the VMEM-resident accumulator (its block index is
    constant across k); it is finalized to |acc * inv_m| on the last k step.
    """
    k = pl.program_id(1)

    @pl.when(k == 0)
    def _():
        out_ref[...] = jnp.zeros_like(out_ref)

    o = o_ref[...].astype(jnp.float32)            # (TB, TM) upcast in-register
    e = e_ref[...].astype(jnp.float32)
    contrib = e + c_o * o                          # single fused reduction operand
    if mask_m_tail:                                # only emitted when M % TM != 0
        col = jax.lax.broadcasted_iota(jnp.int32, contrib.shape, 1) + k * tm
        contrib = jnp.where(col < m_total, contrib, 0.0)
    out_ref[...] += jnp.sum(contrib, axis=1, keepdims=True)

    @pl.when(k == pl.num_programs(1) - 1)
    def _():
        out_ref[...] = jnp.abs(out_ref[...] * inv_m)


def _choose_tiles(n, m, itemsize, target_bytes=4 << 20):
    """Pick (tb, tm): tb multiple of 8, tm multiple of 128 (or the full M)."""
    row_bytes = m * itemsize
    if 8 * row_bytes <= target_bytes:
        # Full-width rows; grow the batch dim toward the per-step DMA target,
        # but keep a few batch blocks so the "parallel" axis can shard across TCs.
        tm = m
        tb = (target_bytes // row_bytes) // 8 * 8
        tb_cap_grid = (((n + 3) // 4) + 7) // 8 * 8   # >= ~4 batch blocks
        tb_cap_n = ((n + 7) // 8) * 8
        tb = max(8, min(tb, tb_cap_grid, tb_cap_n))
    else:
        # Rows too wide for a single block: tile M and keep the minimum 8 rows.
        tb = 8
        tm = (target_bytes // (tb * itemsize)) // 128 * 128
        tm = max(128, min(tm, ((m + 127) // 128) * 128))
    return tb, tm


def t_dark(o, e, darkness, *, tile_override=None):
    """o, e: (N, C, H, W). Returns scalar mean(|mean(e-o) + mean(o)/darkness|)."""
    assert o.shape == e.shape, "o and e must share a shape"
    n = int(o.shape[0])
    m = 1
    for d in o.shape[1:]:
        m *= int(d)

    # Lane-dense layout, native dtype: no upcast copy, no padding copy in HBM.
    o2 = o.reshape(n, m)
    e2 = e.reshape(n, m)

    itemsize = o2.dtype.itemsize
    if tile_override is not None:
        tb, tm = tile_override
    else:
        tb, tm = _choose_tiles(n, m, itemsize)
    nb = -(-n // tb)
    nk = -(-m // tm)

    kernel = functools.partial(
        _t_dark_kernel,
        c_o=1.0 / float(darkness) - 1.0,
        inv_m=1.0 / float(m),
        tm=tm,
        m_total=m,
        mask_m_tail=(m % tm != 0),
    )

    per_image = pl.pallas_call(
        kernel,
        out_shape=jax.ShapeDtypeStruct((n, 1), jnp.float32),
        grid_spec=pltpu.PrefetchScalarGridSpec(
            num_scalar_prefetch=0,
            grid=(nb, nk),
            in_specs=[
                pl.BlockSpec((tb, tm), lambda b, k: (b, k)),
                pl.BlockSpec((tb, tm), lambda b, k: (b, k)),
            ],
            out_specs=pl.BlockSpec((tb, 1), lambda b, k: (b, 0)),
        ),
        compiler_params=pltpu.CompilerParams(
            dimension_semantics=("parallel", "arbitrary"),
            vmem_limit_bytes=48 << 20,
        ),
    )(o2, e2)

    # Tiny final mean over the N per-image |...| values, done in the wrapper.
    return jnp.mean(per_image)


def t_dark_ref(o, e, darkness):
    """Pure-JAX reference with the PyTorch module's semantics."""
    darklord = jnp.mean(o, axis=(1, 2, 3)) / darkness
    dis = jnp.mean(e - o, axis=(1, 2, 3))
    return jnp.mean(jnp.abs(dis + darklord))


if __name__ == "__main__":
    key = jax.random.PRNGKey(0)
    k_o, k_e, k_o2, k_e2 = jax.random.split(key, 4)
    darkness = 0.5

    # Primary check: (2, 4, 16, 16) -> one full-width block, ragged batch tail.
    o = jax.random.normal(k_o, (2, 4, 16, 16), dtype=jnp.float32)
    e = o + 0.1 * jax.random.normal(k_e, (2, 4, 16, 16), dtype=jnp.float32)
    out = jax.block_until_ready(t_dark(o, e, darkness))
    ref = jax.block_until_ready(t_dark_ref(o, e, darkness))
    assert jnp.allclose(out, ref, rtol=1e-5, atol=1e-6), (out, ref)

    # Secondary check: force the M-axis accumulator path with a ragged M tail
    # (M=400, TM=128 -> masked last block) and a ragged batch tail (N=3, TB=8).
    o_b = jax.random.normal(k_o2, (3, 4, 10, 10), dtype=jnp.float32)
    e_b = o_b + 0.1 * jax.random.normal(k_e2, (3, 4, 10, 10), dtype=jnp.float32)
    out_b = jax.block_until_ready(t_dark(o_b, e_b, darkness, tile_override=(8, 128)))
    ref_b = jax.block_until_ready(t_dark_ref(o_b, e_b, darkness))
    assert jnp.allclose(out_b, ref_b, rtol=1e-5, atol=1e-6), (out_b, ref_b)

    print("KERNEL_OK")
</pallas_src>

<mosaic_0001>
module attributes {stable_mosaic.version = 11 : i64} {
  func.func @_t_dark_kernel(%arg0: i32, %arg1: i32, %arg2: memref<8x1024xf32, #tpu.memory_space<vmem>>, %arg3: memref<8x1024xf32, #tpu.memory_space<vmem>>, %arg4: memref<8x1xf32, #tpu.memory_space<vmem>>) attributes {dimension_semantics = [#tpu.dimension_semantics<parallel>, #tpu.dimension_semantics<arbitrary>], iteration_bounds = array<i64: 1, 1>, scalar_prefetch = 0 : i64, scratch_operands = 0 : i64, tpu.core_type = #tpu.core_type<tc>, window_params = [{transform_indices = @transform_0, window_bounds = array<i64: 8, 1024>}, {transform_indices = @transform_1, window_bounds = array<i64: 8, 1024>}, {transform_indices = @transform_2, window_bounds = array<i64: 8, 1>}]} {
    %c0_i32 = arith.constant 0 : i32
    %0 = arith.cmpi eq, %arg1, %c0_i32 : i32
    %1 = arith.extui %0 : i1 to i32
    %c0_i32_0 = arith.constant 0 : i32
    %2 = arith.cmpi ne, %1, %c0_i32_0 : i32
    scf.if %2 {
      %cst_11 = arith.constant 0.000000e+00 : f32
      %16 = vector.broadcast %cst_11 : f32 to vector<8x1xf32>
      %c0_12 = arith.constant 0 : index
      %c0_13 = arith.constant 0 : index
      %17 = vector.load %arg4[%c0_12, %c0_13] : memref<8x1xf32, #tpu.memory_space<vmem>>, vector<8x1xf32>
      tpu.vector_store %arg4[%c0_12, %c0_13], %16 {strides = array<i32>} : memref<8x1xf32, #tpu.memory_space<vmem>>, vector<8x1xf32>,
    } else {
    }
    %c0 = arith.constant 0 : index
    %c0_1 = arith.constant 0 : index
    %3 = vector.load %arg2[%c0, %c0_1] : memref<8x1024xf32, #tpu.memory_space<vmem>>, vector<8x1024xf32>
    %c0_2 = arith.constant 0 : index
    %c0_3 = arith.constant 0 : index
    %4 = vector.load %arg3[%c0_2, %c0_3] : memref<8x1024xf32, #tpu.memory_space<vmem>>, vector<8x1024xf32>
    %cst = arith.constant 1.000000e+00 : f32
    %5 = vector.broadcast %cst : f32 to vector<8x1024xf32>
    %6 = arith.mulf %5, %3 : vector<8x1024xf32>
    %7 = arith.addf %4, %6 : vector<8x1024xf32>
    %c0_4 = arith.constant 0 : index
    %c0_5 = arith.constant 0 : index
    %8 = vector.load %arg4[%c0_4, %c0_5] : memref<8x1xf32, #tpu.memory_space<vmem>>, vector<8x1xf32>
    %cst_6 = arith.constant dense<0.000000e+00> : vector<8xf32>
    %9 = vector.multi_reduction <add>, %7, %cst_6 [1] : vector<8x1024xf32> to vector<8xf32>
    %10 = vector.shape_cast %9 : vector<8xf32> to vector<8x1xf32>
    %11 = arith.addf %8, %10 : vector<8x1xf32>
    %c0_7 = arith.constant 0 : index
    %c0_8 = arith.constant 0 : index
    %12 = vector.load %arg4[%c0_7, %c0_8] : memref<8x1xf32, #tpu.memory_space<vmem>>, vector<8x1xf32>
    tpu.vector_store %arg4[%c0_7, %c0_8], %11 {strides = array<i32>} : memref<8x1xf32, #tpu.memory_space<vmem>>, vector<8x1xf32>,
    %c0_i32_9 = arith.constant 0 : i32
    %13 = arith.cmpi eq, %arg1, %c0_i32_9 : i32
    %14 = arith.extui %13 : i1 to i32
    %c0_i32_10 = arith.constant 0 : i32
    %15 = arith.cmpi ne, %14, %c0_i32_10 : i32
    scf.if %15 {
      %c0_11 = arith.constant 0 : index
      %c0_12 = arith.constant 0 : index
      %16 = vector.load %arg4[%c0_11, %c0_12] : memref<8x1xf32, #tpu.memory_space<vmem>>, vector<8x1xf32>
      %cst_13 = arith.constant 9.765625E-4 : f32
      %17 = vector.broadcast %cst_13 : f32 to vector<8x1xf32>
      %18 = arith.mulf %16, %17 : vector<8x1xf32>
      %19 = math.absf %18 : vector<8x1xf32>
      %c0_14 = arith.constant 0 : index
      %c0_15 = arith.constant 0 : index
      %20 = vector.load %arg4[%c0_14, %c0_15] : memref<8x1xf32, #tpu.memory_space<vmem>>, vector<8x1xf32>
      tpu.vector_store %arg4[%c0_14, %c0_15], %19 {strides = array<i32>} : memref<8x1xf32, #tpu.memory_space<vmem>>, vector<8x1xf32>,
    } else {
    }
    return
  }
  func.func @transform_0(%arg0: i32, %arg1: i32) -> (i32, i32) {
    %c0_i32 = arith.constant 0 : i32
    return %arg0, %arg1 : i32, i32
  }
  func.func @transform_1(%arg0: i32, %arg1: i32) -> (i32, i32) {
    %c0_i32 = arith.constant 0 : i32
    return %arg0, %arg1 : i32, i32
  }
  func.func @transform_2(%arg0: i32, %arg1: i32) -> (i32, i32) {
    %c0_i32 = arith.constant 0 : i32
    %c0_i32_0 = arith.constant 0 : i32
    return %arg0, %c0_i32 : i32, i32
  }
}

</mosaic_0001>

<bundles_post_ra>
// kernel: tpu_custom_call.1
= control target key start
LH: loop header
LB: loop body
LE: loop exit
PB: predicated region body
PF: predicated region fallthrough
CT: control target
= control target key end

     0   :  { %7 = vsyncpa [#allocation3], 0  ;;  %s264_s0 = inlined_call_operand.hbm [shape: f32[2,1024], index: 0, kind: input, shape index: {}]   ;;  %s265_s1 = inlined_call_operand.hbm [shape: f32[2,1024], index: 1, kind: input, shape index: {}]   ;;  %s266_s2 = inlined_call_operand.vmem [shape: f32[2,1], index: 2, kind: output, shape index: {}]  }
   0x1   :  { %8 = vsyncpa [#allocation5], 0 }
   0x2   :  { %12 = vsyncadd [#allocation3], 768  ;;  %s13_s11 = sshll.u32 %s264_s0, 4  ;;  %s232_s12 = smov [#allocation2]   ;;  %s14_s11 = int_to_ptr.hbm [resolvable:$true] %s13_s11 }
   0x3   :  { %s15_s13 = sshll.u32 %s232_s12, 4  ;;  %s233_s14 = smov 256   ;;  %s16_s13 = int_to_ptr.vmem [resolvable:$true] %s15_s13 }
   0x4   :  { %s234_s15 = smov 16  }
   0x5   :  { %21 = dma.hbm_to_vmem [thread:$0]  %s14_s11, 256, %s16_s13, [#allocation3], %s233_s14, %s233_s14, %s234_s15  }
   0x6   :  { %25 = vsyncadd [#allocation5], 768  ;;  %s26_s18 = sshll.u32 %s265_s1, 4  ;;  %s235_s19 = smov [#allocation4]   ;;  %s27_s18 = int_to_ptr.hbm [resolvable:$true] %s26_s18 }
   0x7   :  { %s28_s20 = sshll.u32 %s235_s19, 4  ;;  %s29_s20 = int_to_ptr.vmem [resolvable:$true] %s28_s20 }
   0x8   :  { %34 = dma.hbm_to_vmem [thread:$0]  %s27_s18, 256, %s29_s20, [#allocation5], %s233_s14, %s233_s14, %s234_s15  }
   0x9   :  { %228 = dma.done.wait [#allocation3], 1024  }
   0xa   :  { %229 = vsyncadd [#allocation3], 4294966272 }
   0xb   :  { %230 = dma.done.wait [#allocation5], 1024  }
   0xc   :  { %231 = vsyncadd [#allocation5], 4294966272  ;;  %vm47_vm0 = vcmask 7168   ;;  %v236_v0 = vmov 0.0   ;;  %v49_v1 = vld [vmem:[#allocation2] sm:$0xff]  ;;  %v50_v2 = vld [vmem:[#allocation2 + $0x8] sm:$0xff] }
   0xd   :  { %48 = vst.msk [vmem:[#allocation6] sm:$0xff] %vm47_vm0, %v236_v0  ;;  %v51_v3 = vld [vmem:[#allocation2 + $0x10] sm:$0xff]  ;;  %v52_v4 = vld [vmem:[#allocation2 + $0x18] sm:$0xff]  ;;  %v53_v5 = vld [vmem:[#allocation2 + $0x20] sm:$0xff] }
   0xe   :  { %v54_v6 = vld [vmem:[#allocation2 + $0x28] sm:$0xff]  ;;  %v55_v7 = vld [vmem:[#allocation2 + $0x30] sm:$0xff]  ;;  %v57_v8 = vld [vmem:[#allocation4] sm:$0xff] }
   0xf   :  { %v58_v9 = vld [vmem:[#allocation4 + $0x8] sm:$0xff]  ;;  %v59_v10 = vld [vmem:[#allocation4 + $0x10] sm:$0xff]  ;;  %v60_v11 = vld [vmem:[#allocation4 + $0x18] sm:$0xff]  ;;  %v65_v12 = vadd.f32 %v57_v8, %v49_v1 }
  0x10   :  { %v61_v13 = vld [vmem:[#allocation4 + $0x20] sm:$0xff]  ;;  %v62_v14 = vld [vmem:[#allocation4 + $0x28] sm:$0xff]  ;;  %v63_v15 = vld [vmem:[#allocation4 + $0x30] sm:$0xff]  ;;  %v67_v16 = vadd.f32 %v59_v10, %v51_v3  ;;  %v66_v19 = vadd.f32 %v58_v9, %v50_v2  ;;  %v68_v22 = vadd.f32 %v60_v11, %v52_v4 }
  0x11   :  { %v56_v17 = vld [vmem:[#allocation2 + $0x38] sm:$0xff]  ;;  %v69_v20 = vadd.f32 %v61_v13, %v53_v5  ;;  %v71_v21 = vadd.f32 %v63_v15, %v55_v7  ;;  %82 = vst [vmem:[#allocation1] ss:$4 sm:$0xff] %v65_v12  ;;  %v70_v23 = vadd.f32 %v62_v14, %v54_v6 }
  0x12   :  { %v64_v18 = vld [vmem:[#allocation4 + $0x38] sm:$0xff]  ;;  %84 = vst [vmem:[#allocation1 + $0x1] ss:$4 sm:$0xff] %v67_v16 }
  0x13   :  { %86 = vst [vmem:[#allocation1 + $0x2] ss:$4 sm:$0xff] %v69_v20  ;;  %v72_v24 = vadd.f32 %v64_v18, %v56_v17 }
  0x14   :  { %88 = vst [vmem:[#allocation1 + $0x3] ss:$4 sm:$0xff] %v71_v21  ;;  %v73_v40 = vld [vmem:[#allocation6] sm:$0xff] }
  0x15   :  { %90 = vst [vmem:[#allocation1 + $0x20] ss:$4 sm:$0xff] %v66_v19 }
  0x16   :  { %92 = vst [vmem:[#allocation1 + $0x21] ss:$4 sm:$0xff] %v68_v22 }
  0x17   :  { %94 = vst [vmem:[#allocation1 + $0x22] ss:$4 sm:$0xff] %v70_v23 }
  0x18   :  { %96 = vst [vmem:[#allocation1 + $0x23] ss:$4 sm:$0xff] %v72_v24 }
  0x1b   :  { %v97_v25 = vld.sshfl [vmem:[#allocation1] sm:$0xff pattern:$0x73625140]  ;;  %v98_v26 = vld.sshfl [vmem:[#allocation1 + $0x8] sm:$0xff pattern:$0x73625140] }
  0x1c   :  { %v99_v27 = vld.sshfl [vmem:[#allocation1 + $0x10] sm:$0xff pattern:$0x73625140]  ;;  %v113_v28 = vadd.f32 %v98_v26, %v97_v25  ;;  %v100_v29 = vld.sshfl [vmem:[#allocation1 + $0x18] sm:$0xff pattern:$0x73625140] }
  0x1e   :  { %v114_v30 = vadd.f32 %v113_v28, %v99_v27 }
  0x1f   :  { %v101_v31 = vld.sshfl [vmem:[#allocation1 + $0x20] sm:$0xff pattern:$0x73625140]  ;;  %v102_v33 = vld.sshfl [vmem:[#allocation1 + $0x28] sm:$0xff pattern:$0x73625140] }
  0x20   :  { %v115_v32 = vadd.f32 %v114_v30, %v100_v29  ;;  %v103_v35 = vld.sshfl [vmem:[#allocation1 + $0x30] sm:$0xff pattern:$0x73625140]  ;;  %v104_v37 = vld.sshfl [vmem:[#allocation1 + $0x38] sm:$0xff pattern:$0x73625140] }
  0x22   :  { %v116_v34 = vadd.f32 %v115_v32, %v101_v31 }
  0x24   :  { %v117_v36 = vadd.f32 %v116_v34, %v102_v33 }
  0x26   :  { %v118_v38 = vadd.f32 %v117_v36, %v103_v35 }
  0x28   :  { %v119_v39 = vadd.f32 %v118_v38, %v104_v37 }
  0x2a   :  { %120 = vadd.xlane.f32.xlu0 %v119_v39 }
  0x9d   :  { %v121_v41 = vpop.xlane.xlu0 %120 }
  0x9e   :  { %v122_v42 = vadd.f32 %v121_v41, %v73_v40 }
  0xa0   :  { %124 = vst.msk [vmem:[#allocation6] sm:$0xff] %vm47_vm0, %v122_v42 }
  0xa7   :  { %v128_v43 = vld [vmem:[#allocation6] sm:$0xff] }
  0xa8   :  { %v129_v44 = vmul.f32 0.0009765625, %v128_v43 }
  0xaa   :  { %v130_v45 = vand.u32 2147483647, %v129_v44 }
  0xac   :  { %131 = vst.msk [vmem:[#allocation6] sm:$0xff] %vm47_vm0, %v130_v45 }
  0xb3   :  { %v150_v46 = vld [vmem:[#allocation6] sm:$0x3] }
  0xb4   :  { %151 = vst [vmem:[%s266_s2] sm:$0x3] %v150_v46 }
  0xb5   :  { %169 = vsyncpa [#allocation3], 1 }
  0xb6   :  { %170 = vsyncpa [#allocation5], 1 }

</bundles_post_ra>
